<compile_context>
chip_gen: v7x
topology: tpu7x:2x2x1
jax: 0.10.0
libtpu: 0.0.40
codegen_flags: <defaults>
</compile_context>

<pallas_src>
import functools

import jax
import jax.numpy as jnp
from jax.experimental import pallas as pl
from jax.experimental.pallas import tpu as pltpu


# ----------------------------- kernel bodies --------------------------------

def _excite(p, w1_ref, b1_ref, w2_ref, b2_ref):
    """Squeeze-excite MLP on a (C, 1) f32 column: sigmoid(W2 @ relu(W1 @ p + b1) + b2)."""
    h = jnp.dot(w1_ref[...].astype(jnp.float32), p,
                preferred_element_type=jnp.float32)
    h = jnp.maximum(h + b1_ref[...].astype(jnp.float32), 0.0)            # (Ch, 1)
    g = jnp.dot(w2_ref[...].astype(jnp.float32), h,
                preferred_element_type=jnp.float32)
    return jax.nn.sigmoid(g + b2_ref[...].astype(jnp.float32))           # (C, 1)


def _fused_kernel(x_ref, w1_ref, b1_ref, w2_ref, b2_ref, o_ref, *, inv_s):
    """Single pass: pool + excite MLP + scale on one (1, C, S) block (grid over B)."""
    x = x_ref[0]                                                          # (C, S)
    p = jnp.sum(x.astype(jnp.float32), axis=-1, keepdims=True) * inv_s   # (C, 1) f32
    g = _excite(p, w1_ref, b1_ref, w2_ref, b2_ref)                        # (C, 1) f32
    o_ref[0] = x * g.astype(o_ref.dtype)                                  # lane-broadcast, input dtype


def _pool_mlp_kernel(x_ref, w1_ref, b1_ref, w2_ref, b2_ref, gate_ref, acc_ref, *, inv_s):
    """Fallback pass 1: tiled spatial mean with f32 resident accumulator;
    the excite MLP runs in-kernel at the last spatial step and emits the gate."""
    s = pl.program_id(1)

    @pl.when(s == 0)
    def _():
        acc_ref[...] = jnp.zeros_like(acc_ref)

    acc_ref[0] += jnp.sum(x_ref[0].astype(jnp.float32), axis=-1, keepdims=True)

    @pl.when(s == pl.num_programs(1) - 1)
    def _():
        p = acc_ref[0] * inv_s                                            # (C, 1) f32
        gate_ref[0] = _excite(p, w1_ref, b1_ref, w2_ref, b2_ref).astype(gate_ref.dtype)


def _scale_kernel(gate_ref, x_ref, o_ref):
    """Fallback pass 2: out = x * gate (gate broadcast along lanes, input dtype)."""
    o_ref[0] = x_ref[0] * gate_ref[0]


# ----------------------------- host-side helpers ----------------------------

def _vmem_budget_bytes():
    """Usable VMEM budget for this TPU generation, with headroom for compiler scratch."""
    try:
        cap = int(pltpu.get_tpu_info().vmem_capacity_bytes)
    except Exception:
        cap = 64 * 1024 * 1024          # conservative default: v7x has 64 MiB per TC
    return cap * 3 // 4                 # ~48 MiB on v7x, ~96 MiB on v5e/v6e


def _pick_spatial_tile(s, c, itemsize, budget, max_tile=2048):
    """Largest 128-multiple tile that divides S, fits the VMEM budget, <= max_tile."""
    if s % 128 != 0:
        # TODO(synk): handle non-128-multiple spatial extents with a masked tail
        # (pl.cdiv grid) or a channel-tiled grid instead of a full-extent block
        # when C*S is too large for v7x's 64 MiB VMEM.
        return s
    t = (min(max_tile, s) // 128) * 128
    while t > 128:
        # pass 2 is the binding constraint: double-buffered (C, t) x-in + out blocks
        if s % t == 0 and 4 * c * t * itemsize <= budget:
            return t
        t -= 128
    return 128


def se_block(x_nchw, w1, b1, w2, b2, *, max_fused_bytes=None):
    """SEBlock forward.

    x_nchw: (B, C, H, W)
    w1: (C//r, C)  -- torch conv1 weight (out, in), 1x1 kernel squeezed
    b1: (C//r,)
    w2: (C, C//r)  -- torch conv2 weight (out, in), 1x1 kernel squeezed
    b2: (C,)
    """
    B, C, H, W = x_nchw.shape
    S = H * W
    itemsize = jnp.dtype(x_nchw.dtype).itemsize
    inv_s = 1.0 / float(S)

    # (B, C, H, W) -> (B, C, S): metadata-only reshape, zero HBM traffic.
    x = x_nchw.reshape(B, C, S)

    # Column-vector orientation for the in-kernel MLP (gate = sig(W2 @ relu(W1 @ p + b1) + b2)).
    hid = w1.shape[0]
    b1c = b1.reshape(hid, 1)
    b2c = b2.reshape(C, 1)

    budget = _vmem_budget_bytes()
    weight_bytes = sum(int(a.size) * jnp.dtype(a.dtype).itemsize
                       for a in (w1, b1c, w2, b2c))

    # Tiny weights are passed as full-extent blocks at a constant index (works for
    # both the 1-D fused grid and the 2-D fallback grid).
    weight_specs = [
        pl.BlockSpec(w1.shape, lambda *a: (0, 0)),
        pl.BlockSpec(b1c.shape, lambda *a: (0, 0)),
        pl.BlockSpec(w2.shape, lambda *a: (0, 0)),
        pl.BlockSpec(b2c.shape, lambda *a: (0, 0)),
    ]

    # ---------------- fused single-pass path (x read once, written once) ----------------
    # VMEM need: double-buffered x-in + out blocks, an f32 temp for the pooled
    # cast/reduce, the weights, plus slack for compiler internals.
    fused_need = 4 * C * S * itemsize + 4 * C * S + 2 * weight_bytes + (1 << 20)
    fused_limit = budget if max_fused_bytes is None else max_fused_bytes

    if fused_need <= fused_limit:
        out = pl.pallas_call(
            functools.partial(_fused_kernel, inv_s=inv_s),
            out_shape=jax.ShapeDtypeStruct((B, C, S), x.dtype),
            grid_spec=pltpu.PrefetchScalarGridSpec(
                num_scalar_prefetch=0,
                grid=(B,),
                in_specs=[pl.BlockSpec((1, C, S), lambda b: (b, 0, 0))] + weight_specs,
                out_specs=pl.BlockSpec((1, C, S), lambda b: (b, 0, 0)),
            ),
            compiler_params=pltpu.CompilerParams(
                dimension_semantics=("parallel",),
                vmem_limit_bytes=int(budget),
            ),
            cost_estimate=pl.CostEstimate(
                flops=3 * B * C * S,
                transcendentals=B * C,
                bytes_accessed=2 * B * C * S * itemsize + weight_bytes,
            ),
        )(x, w1, b1c, w2, b2c)
        return out.reshape(B, C, H, W)

    # ---------------- two-pass fallback (large C*S) ----------------
    TS = _pick_spatial_tile(S, C, itemsize, budget)
    n_s = S // TS

    # Pass 1: pooled mean + excite MLP fused in-kernel; emits the gate (B, C, 1).
    gate = pl.pallas_call(
        functools.partial(_pool_mlp_kernel, inv_s=inv_s),
        out_shape=jax.ShapeDtypeStruct((B, C, 1), x.dtype),
        grid_spec=pltpu.PrefetchScalarGridSpec(
            num_scalar_prefetch=0,
            grid=(B, n_s),
            in_specs=[pl.BlockSpec((1, C, TS), lambda b, s: (b, 0, s))] + weight_specs,
            out_specs=pl.BlockSpec((1, C, 1), lambda b, s: (b, 0, 0)),
            scratch_shapes=[pltpu.VMEM((1, C, 1), jnp.float32)],
        ),
        compiler_params=pltpu.CompilerParams(
            dimension_semantics=("parallel", "arbitrary"),
            vmem_limit_bytes=int(budget),
        ),
        cost_estimate=pl.CostEstimate(
            flops=B * C * S,
            transcendentals=B * C,
            bytes_accessed=B * C * S * itemsize + B * C * itemsize + weight_bytes,
        ),
    )(x, w1, b1c, w2, b2c)

    # Pass 2: lane-dense broadcast scale in the input dtype.
    out = pl.pallas_call(
        _scale_kernel,
        out_shape=jax.ShapeDtypeStruct((B, C, S), x.dtype),
        grid_spec=pltpu.PrefetchScalarGridSpec(
            num_scalar_prefetch=0,
            grid=(B, n_s),
            in_specs=[
                pl.BlockSpec((1, C, 1), lambda b, s: (b, 0, 0)),    # gate (resident)
                pl.BlockSpec((1, C, TS), lambda b, s: (b, 0, s)),   # x
            ],
            out_specs=pl.BlockSpec((1, C, TS), lambda b, s: (b, 0, s)),
        ),
        compiler_params=pltpu.CompilerParams(
            dimension_semantics=("parallel", "parallel"),
            vmem_limit_bytes=int(budget),
        ),
        cost_estimate=pl.CostEstimate(
            flops=B * C * S,
            transcendentals=0,
            bytes_accessed=2 * B * C * S * itemsize + B * C * itemsize,
        ),
    )(gate, x)

    return out.reshape(B, C, H, W)


# ----------------------------- reference & test ------------------------------

def _reference(x, w1, b1, w2, b2):
    """Pure-JAX reference of the PyTorch forward."""
    y = jnp.mean(x, axis=(2, 3))                        # (B, C)
    h = jnp.maximum(y @ w1.T + b1, 0.0)                 # (B, C//r)
    g = jax.nn.sigmoid(h @ w2.T + b2)                   # (B, C)
    return x * g[:, :, None, None]


if __name__ == "__main__":
    # Shapes consistent with the module: channels=32, reduction_ratio=16 -> hidden=2.
    B, C, H, W = 2, 32, 16, 16
    reduction_ratio = 16
    hidden = max(C // reduction_ratio, 1)

    key = jax.random.PRNGKey(0)
    kx, k1, k2, k3, k4 = jax.random.split(key, 5)

    x = jax.random.normal(kx, (B, C, H, W), dtype=jnp.float32)
    # Torch Conv2d 1x1 weights, squeezed to (out, in).
    w1 = jax.random.normal(k1, (hidden, C), dtype=jnp.float32) * 0.1
    b1 = jax.random.normal(k2, (hidden,), dtype=jnp.float32) * 0.1
    w2 = jax.random.normal(k3, (C, hidden), dtype=jnp.float32) * 0.1
    b2 = jax.random.normal(k4, (C,), dtype=jnp.float32) * 0.1

    ref = _reference(x, w1, b1, w2, b2)

    # Fused single-pass path (default for shapes that fit VMEM).
    out_fused = jax.block_until_ready(se_block(x, w1, b1, w2, b2))
    assert out_fused.shape == (B, C, H, W)
    assert jnp.allclose(out_fused, ref, atol=1e-5, rtol=1e-5), "fused path mismatch"

    # Two-pass fallback path (forced, to exercise it at small shapes).
    out_2p = jax.block_until_ready(se_block(x, w1, b1, w2, b2, max_fused_bytes=0))
    assert out_2p.shape == (B, C, H, W)
    assert jnp.allclose(out_2p, ref, atol=1e-5, rtol=1e-5), "two-pass path mismatch"

    print("KERNEL_OK")
</pallas_src>

<mosaic_0001>
module attributes {stable_mosaic.version = 11 : i64} {
  func.func @_fused_kernel(%arg0: i32, %arg1: memref<1x32x256xf32, #tpu.memory_space<vmem>>, %arg2: memref<2x32xf32, #tpu.memory_space<vmem>>, %arg3: memref<2x1xf32, #tpu.memory_space<vmem>>, %arg4: memref<32x2xf32, #tpu.memory_space<vmem>>, %arg5: memref<32x1xf32, #tpu.memory_space<vmem>>, %arg6: memref<1x32x256xf32, #tpu.memory_space<vmem>>) attributes {dimension_semantics = [#tpu.dimension_semantics<parallel>], iteration_bounds = array<i64: 2>, scalar_prefetch = 0 : i64, scratch_operands = 0 : i64, tpu.core_type = #tpu.core_type<tc>, window_params = [{transform_indices = @transform_0, window_bounds = array<i64: 1, 32, 256>}, {pipeline_mode = #tpu.pipeline_mode<synchronous>, transform_indices = @transform_1, window_bounds = array<i64: 2, 32>}, {pipeline_mode = #tpu.pipeline_mode<synchronous>, transform_indices = @transform_2, window_bounds = array<i64: 2, 1>}, {pipeline_mode = #tpu.pipeline_mode<synchronous>, transform_indices = @transform_3, window_bounds = array<i64: 32, 2>}, {pipeline_mode = #tpu.pipeline_mode<synchronous>, transform_indices = @transform_4, window_bounds = array<i64: 32, 1>}, {transform_indices = @transform_5, window_bounds = array<i64: 1, 32, 256>}]} {
    %c0 = arith.constant 0 : index
    %c0_0 = arith.constant 0 : index
    %c0_1 = arith.constant 0 : index
    %0 = vector.load %arg1[%c0, %c0_0, %c0_1] : memref<1x32x256xf32, #tpu.memory_space<vmem>>, vector<1x32x256xf32>
    %1 = vector.shape_cast %0 : vector<1x32x256xf32> to vector<32x256xf32>
    %cst = arith.constant dense<0.000000e+00> : vector<32xf32>
    %2 = vector.multi_reduction <add>, %1, %cst [1] : vector<32x256xf32> to vector<32xf32>
    %3 = vector.shape_cast %2 : vector<32xf32> to vector<32x1xf32>
    %cst_2 = arith.constant 3.906250e-03 : f32
    %4 = vector.broadcast %cst_2 : f32 to vector<32x1xf32>
    %5 = arith.mulf %3, %4 : vector<32x1xf32>
    %c0_3 = arith.constant 0 : index
    %c0_4 = arith.constant 0 : index
    %6 = vector.load %arg2[%c0_3, %c0_4] : memref<2x32xf32, #tpu.memory_space<vmem>>, vector<2x32xf32>
    %cst_5 = arith.constant dense<0.000000e+00> : vector<2x1xf32>
    %7 = tpu.matmul %6, %5, %cst_5 {dimension_numbers = #tpu.dot_dimension_numbers<[1], [0], [0], [1], [0, 0, 1, 1], [], []>} : vector<2x32xf32>, vector<32x1xf32>, vector<2x1xf32> -> vector<2x1xf32>
    %c0_6 = arith.constant 0 : index
    %c0_7 = arith.constant 0 : index
    %8 = vector.load %arg3[%c0_6, %c0_7] : memref<2x1xf32, #tpu.memory_space<vmem>>, vector<2x1xf32>
    %9 = arith.addf %7, %8 : vector<2x1xf32>
    %cst_8 = arith.constant 0.000000e+00 : f32
    %10 = vector.broadcast %cst_8 : f32 to vector<2x1xf32>
    %11 = arith.maximumf %9, %10 : vector<2x1xf32>
    %c0_9 = arith.constant 0 : index
    %c0_10 = arith.constant 0 : index
    %12 = vector.load %arg4[%c0_9, %c0_10] : memref<32x2xf32, #tpu.memory_space<vmem>>, vector<32x2xf32>
    %cst_11 = arith.constant dense<0.000000e+00> : vector<32x1xf32>
    %13 = tpu.matmul %12, %11, %cst_11 {dimension_numbers = #tpu.dot_dimension_numbers<[1], [0], [0], [1], [0, 0, 1, 1], [], []>} : vector<32x2xf32>, vector<2x1xf32>, vector<32x1xf32> -> vector<32x1xf32>
    %c0_12 = arith.constant 0 : index
    %c0_13 = arith.constant 0 : index
    %14 = vector.load %arg5[%c0_12, %c0_13] : memref<32x1xf32, #tpu.memory_space<vmem>>, vector<32x1xf32>
    %15 = arith.addf %13, %14 : vector<32x1xf32>
    %16 = arith.negf %15 : vector<32x1xf32>
    %17 = math.exp %16 : vector<32x1xf32>
    %cst_14 = arith.constant 1.000000e+00 : f32
    %18 = vector.broadcast %cst_14 : f32 to vector<32x1xf32>
    %19 = arith.addf %18, %17 : vector<32x1xf32>
    %20 = arith.divf %18, %19 : vector<32x1xf32>
    %21 = vector.broadcast %20 : vector<32x1xf32> to vector<32x256xf32>
    %22 = arith.mulf %1, %21 : vector<32x256xf32>
    %c0_15 = arith.constant 0 : index
    %c0_16 = arith.constant 0 : index
    %c0_17 = arith.constant 0 : index
    %23 = vector.load %arg6[%c0_15, %c0_16, %c0_17] : memref<1x32x256xf32, #tpu.memory_space<vmem>>, vector<1x32x256xf32>
    %24 = vector.shape_cast %23 : vector<1x32x256xf32> to vector<32x256xf32>
    %25 = vector.shape_cast %22 : vector<32x256xf32> to vector<1x32x256xf32>
    tpu.vector_store %arg6[%c0_15, %c0_16, %c0_17], %25 {strides = array<i32>} : memref<1x32x256xf32, #tpu.memory_space<vmem>>, vector<1x32x256xf32>,
    return
  }
  func.func @transform_0(%arg0: i32) -> (i32, i32, i32) {
    %c0_i32 = arith.constant 0 : i32
    %c0_i32_0 = arith.constant 0 : i32
    %c0_i32_1 = arith.constant 0 : i32
    return %arg0, %c0_i32, %c0_i32_0 : i32, i32, i32
  }
  func.func @transform_1(%arg0: i32) -> (i32, i32) {
    %c0_i32 = arith.constant 0 : i32
    %c0_i32_0 = arith.constant 0 : i32
    %c0_i32_1 = arith.constant 0 : i32
    return %c0_i32, %c0_i32_0 : i32, i32
  }
  func.func @transform_2(%arg0: i32) -> (i32, i32) {
    %c0_i32 = arith.constant 0 : i32
    %c0_i32_0 = arith.constant 0 : i32
    %c0_i32_1 = arith.constant 0 : i32
    return %c0_i32, %c0_i32_0 : i32, i32
  }
  func.func @transform_3(%arg0: i32) -> (i32, i32) {
    %c0_i32 = arith.constant 0 : i32
    %c0_i32_0 = arith.constant 0 : i32
    %c0_i32_1 = arith.constant 0 : i32
    return %c0_i32, %c0_i32_0 : i32, i32
  }
  func.func @transform_4(%arg0: i32) -> (i32, i32) {
    %c0_i32 = arith.constant 0 : i32
    %c0_i32_0 = arith.constant 0 : i32
    %c0_i32_1 = arith.constant 0 : i32
    return %c0_i32, %c0_i32_0 : i32, i32
  }
  func.func @transform_5(%arg0: i32) -> (i32, i32, i32) {
    %c0_i32 = arith.constant 0 : i32
    %c0_i32_0 = arith.constant 0 : i32
    %c0_i32_1 = arith.constant 0 : i32
    return %arg0, %c0_i32, %c0_i32_0 : i32, i32, i32
  }
}

</mosaic_0001>

<bundles_post_ra>
// kernel: tpu_custom_call.1
= control target key start
LH: loop header
LB: loop body
LE: loop exit
PB: predicated region body
PF: predicated region fallthrough
CT: control target
= control target key end

     0   :  { %10 = vsyncpa [#allocation3], 0  ;;  %s1100_s0 = inlined_call_operand.hbm [shape: f32[2,32,256], index: 0, kind: input, shape index: {}]   ;;  %s1101_s1 = inlined_call_operand.vmem [shape: f32[2,32], index: 1, kind: input, shape index: {}]   ;;  %s1102_s2 = inlined_call_operand.vmem [shape: f32[2,1], index: 2, kind: input, shape index: {}]   ;;  %s1103_s3 = inlined_call_operand.vmem [shape: f32[32,2], index: 3, kind: input, shape index: {}]   ;;  %s1104_s4 = inlined_call_operand.vmem [shape: f32[32,1], index: 4, kind: input, shape index: {}]   ;;  %s1105_s5 = inlined_call_operand.hbm [shape: f32[2,32,256], index: 5, kind: output, shape index: {}]  }
   0x1   :  { %12 = vsyncpa [#allocation3 + $0x1], 0 }
   0x2   :  { %13 = vsyncpa [#allocation4], 0 }
   0x3   :  { %15 = vsyncpa [#allocation4 + $0x1], 0  ;;  %s872_s18 = smov 0   ;;  %s874_s19 = smov 0  }
   0x4   :  { %s876_s20 = smov 0   ;;  %s878_s21 = smov 0  }
   0x5 LB: > { %s893_s22 = sadd.s32 4294967295, %s830_s21   ;;  %s601_s23 = sadd.s32 4294967294, %s830_s21   ;;  %s830_s21 = sphi %s878_s21, %s1118_s21   ;;  %s826_s20 = sphi %s876_s20, %s1117_s20   ;;  %s822_s19 = sphi %s874_s19, %s1116_s19   ;;  %s818_s18 = sphi %s872_s18, %s1115_s18  }
   0x6   : > { %s897_s24 = sadd.s32 1, %s830_s21   ;;  %s28_s25 = sadd.s32 1, %s826_s20 }
   0x7   : > { %s25_s26 = ssub.s32 %s830_s21, %s897_s24  ;;  %p35_p0 = scmp.ne.s32.totalorder %s826_s20, %s822_s19 }
   0x8   : > { %p26_p1 = scmp.eq.s32.totalorder %s25_s26, 0  ;;  %p36_p2 = scmp.eq.s32.totalorder %s830_s21, 0 }
   0x9   : > { %p41_p3 = scmp.ne.s32.totalorder %s822_s19, %s818_s18  ;;  %p42_p4 = scmp.eq.s32.totalorder %s893_s22, 0 }
   0xa   : > { %s909_s27 = scalar_select %p26_p1, %s826_s20, %s28_s25  }
   0xb   : > { %p911_p5 = por %p36_p2, %p35_p0  ;;  %p915_p6 = por %p42_p4, %p41_p3 }
   0xc   : > { %p149_p7 = scmp.eq.s32.totalorder %s893_s22, 1  ;;  %p155_p8 = scmp.eq.s32.totalorder %s601_s23, 1 }
   0xd   : > { %p674_p10 = scmp.lt.s32.totalorder %s830_s21, 2  ;;  %s187_s7 = sand.u32 1, %s826_s20  }
   0xe   : > { %p922_p11 = por %p149_p7, %p35_p0  ;;  %p926_p12 = por %p155_p8, %p41_p3 }
   0xf   : > { %s625_s8 = sshll.u32 %s830_s21, 10  ;;  %s604_s9 = sshll.u32 %s187_s7, 6 }
  0x10   : > { %s1109_s30 = scalar_select %p922_p11, 1, 0 }
  0x11   : > { %s1110_s6 = scalar_select %p926_p12, 1, 0 }
  0x12   : > { %s935_s12 = scalar_lea.hbm %s1100_s0, %s625_s8  ;;  %s191_s13 = scalar_lea.vmem [#allocation2], %s604_s9 }
  0x13   : > { %s198_s14 = sshll.u32 %s191_s13, 4  ;;  %p939_p13 = pnand %p674_p10, %p911_p5  ;;  %s943_s14 = int_to_ptr.vmem [resolvable:$true] %s198_s14 }
  0x14   : > { %s945_s16 = scalar_lea.sflag [#allocation3], %s187_s7  ;;  %s734_s17 = scalar_lea.hbm %s935_s12, 1024 }
  0x15   : > { %p735_p0 = scmp.ne.s32.totalorder %s935_s12, %s734_s17  ;;  %p736_p1 = pneg %p939_p13 }
  0x16   : > { %s739_s26 = scalar_lea.hbm %s1100_s0, 2048  ;;  %p740_p4 = scmp.lt.u32.totalorder %s935_s12, %s1100_s0 }
  0x17   : > { %p737_p2 = pnand %p736_p1, %p735_p0  ;;  %p741_p5 = scmp.lt.u32.totalorder %s739_s26, %s734_s17 }
  0x18   : > { %p743_p8 = scmp.lt.u32.totalorder %s734_s17, %s935_s12 }
  0x19   : > { %p738_p3 = pneg %p737_p2  ;;  %p742_p7 = por %p741_p5, %p740_p4 }
  0x1b   : > { %p744_p10 = por %p743_p8, %p742_p7 }
  0x1d   : > { %p745_p9 = pnand %p744_p10, %p738_p3 }
  0x1f   : > { %748 = shalt.err (!%p745_p9)
}
  0x20   : > { %s749_s7 = scalar_lea.vmem %s943_s14, 1024  ;;  %s832_s9 = smov [#allocation2]  }
  0x21   : > { %p750_p0 = scmp.ne.s32.totalorder %s943_s14, %s749_s7  ;;  %s754_s10 = sshll.u32 %s832_s9, 4  ;;  %s755_s10 = int_to_ptr.vmem [resolvable:$false] %s754_s10 }
  0x22   : > { %s756_s11 = scalar_lea.vmem %s755_s10, 2048  ;;  %p757_p11 = scmp.lt.s32.totalorder %s943_s14, %s755_s10 }
  0x23   : > { %p752_p2 = pnand %p750_p0, %p736_p1  ;;  %p758_p4 = scmp.lt.s32.totalorder %s756_s11, %s749_s7 }
  0x25   : > { %p753_p12 = pneg %p752_p2  ;;  %p759_p5 = por %p758_p4, %p757_p11 }
  0x27   : > { %p760_p7 = pnand %p759_p5, %p753_p12 }
  0x29   : > { %763 = shalt.err (!%p760_p7)
}
  0x2a   : > { %s833_s13 = smov 256   ;;  %s834_s17 = smov 16  }
  0x2b   : > { %669 = dma.hbm_to_vmem [thread:$0]  (!%p939_p13), %s935_s12, 1024, %s943_s14, %s945_s16, %s833_s13, %s833_s13, %s834_s17  }
  0x2c   : > { %p607_p9 = scmp.ge.s32.totalorder %s830_s21, 1  ;;  %p206_p1 = scmp.lt.s32.totalorder %s830_s21, 3 }
  0x2e   : > { %p207_p3 = pnand %p607_p9, %p206_p1 }
  0x2f   : > { %s976_s23 = sand.u32 (!%p207_p3), 1, %s822_s19  }
  0x30   : > { %210 = sbr.rel (%p207_p3) target bundleno = 829 (0x33d), region = 40  ;;  %s608_s25 = sshll.u32 (!%p207_p3), %s976_s23, 6 }
  0x31   : > { %s213_s26 = scalar_lea.sflag (!%p207_p3), [#allocation3], %s976_s23  ;;  %s216_s28 = scalar_lea.vmem (!%p207_p3), [#allocation2], %s608_s25 }
  0x37   : > { %809 = dma.done.wait (%p915_p6), %s213_s26, 1024  }
  0x38   : > { %811 = vsyncadd (%p915_p6), %s213_s26, 4294966272  ;;  %v986_v0 = vld [vmem:[%s216_s28 + $0x20] sm:$0xff]  ;;  %v988_v1 = vld [vmem:[%s216_s28 + $0x28] sm:$0xff]  ;;  %v835_v12 = vmov 0.0|0.0   ;;  %vm836_vm0 = vmmov 0   ;;  %v837_v13 = vmov 0.0  }
  0x39   : > { %v990_v2 = vld [vmem:[%s216_s28] sm:$0xff]  ;;  %v257_v3 = vadd.f32 %v988_v1, %v986_v0  ;;  %v994_v4 = vld [vmem:[%s216_s28 + $0x8] sm:$0xff]  ;;  %v996_v5 = vld [vmem:[%s216_s28 + $0x30] sm:$0xff]  ;;  %656 = vmatprep.subr.bf16.mxu0 %v835_v12  ;;  %645 = vmatprep.mubr.msk.f32.mxu0 %vm836_vm0, %v837_v13  ;;  %vm269_vm1 = vcmask 261120   ;;  %vm352_vm2 = vcmask 15360   ;;  %vm365_vm3 = vcmask 1041408  }
  0x3a   : > { %v998_v6 = vld [vmem:[%s216_s28 + $0x38] sm:$0xff]  ;;  %v251_v7 = vadd.f32 %v994_v4, %v990_v2  ;;  %v1002_v8 = vld [vmem:[%s216_s28 + $0x10] sm:$0xff]  ;;  %v267_v24 = vld [vmem:[%s1101_s1] sm:$0x3]  ;;  %v838_v34 = vmov 0   ;;  %s242_s7 = scalar_lea.vmem [#allocation5], %s608_s25 }
  0x3b   : > { %v1004_v9 = vld [vmem:[%s216_s28 + $0x18] sm:$0xff]  ;;  %258 = vadd.xlane.f32.xlu1 %v257_v3  ;;  %v260_v10 = vadd.f32 %v998_v6, %v996_v5  ;;  %v344_v25 = vld [vmem:[%s1103_s3] sm:$0xff]  ;;  %v345_v31 = vld [vmem:[%s1103_s3 + $0x8] sm:$0xff]  ;;  %716 = vset.pattern.permute.xlu0 %v838_v34  ;;  %s528_s9 = sshll.u32 %s242_s7, 4  ;;  %s626_s10 = sshll.u32 %s893_s22, 10  ;;  %s1049_s9 = int_to_ptr.vmem [resolvable:$true] %s528_s9 }
  0x3c   : > { %252 = vadd.xlane.f32.xlu0 %v251_v7  ;;  %v254_v11 = vadd.f32 %v1004_v9, %v1002_v8  ;;  %650 = vmatprep.mubr.msk.f32.mxu1 %vm352_vm2, %v344_v25  ;;  %v268_v26 = vld [vmem:[%s1102_s2] sm:$0x3]  ;;  %v346_v32 = vld [vmem:[%s1103_s3 + $0x10] sm:$0xff]  ;;  %v347_v33 = vld [vmem:[%s1103_s3 + $0x18] sm:$0xff]  ;;  %s1054_s13 = scalar_lea.hbm %s1105_s5, %s626_s10  ;;  %s515_s22 = scalar_lea.sflag [#allocation4], %s976_s23 }
  0x3d   : > { %717 = vset.pattern.permute.xlu1 %v838_v34  ;;  %v349_v35 = vld [vmem:[%s1104_s4 + $0x8] sm:$0xff]  ;;  %v348_v36 = vld [vmem:[%s1104_s4] sm:$0xff]  ;;  %v351_v41 = vld [vmem:[%s1104_s4 + $0x18] sm:$0xff]  ;;  %s764_s17 = scalar_lea.vmem %s1049_s9, 1024  ;;  %p1112_p11 = scmp.ne.s32.totalorder %s1109_s30, 0 }
  0x3e   : > { %v350_v43 = vld [vmem:[%s1104_s4 + $0x10] sm:$0xff]  ;;  %p765_p6 = scmp.ne.s32.totalorder %s1049_s9, %s764_s17  ;;  %s839_s26 = smov [#allocation5]  }
  0x3f   : > { %261 = vadd.xlane.f32.xlu1 %v260_v10  ;;  %s768_s28 = sshll.u32 %s839_s26, 4  ;;  %s769_s28 = int_to_ptr.vmem [resolvable:$false] %s768_s28 }
  0x40   : > { %255 = vadd.xlane.f32.xlu0 %v254_v11  ;;  %p766_p12 = pnand %p765_p6, %p1112_p11  ;;  %s770_s29 = scalar_lea.vmem %s769_s28, 2048 }
  0x41   : > { %p771_p8 = scmp.lt.s32.totalorder %s1049_s9, %s769_s28  ;;  %p772_p10 = scmp.lt.s32.totalorder %s770_s29, %s764_s17 }
  0x42   : > { %p767_p13 = pneg %p766_p12 }
  0x43   : > { %p773_p0 = por %p772_p10, %p771_p8 }
  0x45   : > { %p774_p2 = pnand %p773_p0, %p767_p13 }
  0xc8   : > { %v259_v14 = vpop.xlane.xlu1 %258 }
  0xc9   : > { %v253_v15 = vpop.xlane.xlu0 %252  ;;  %v265_v20 = vmul.f32 0.00390625, %v259_v14 }
  0xca   : > { %v263_v18 = vmul.f32 0.00390625, %v253_v15 }
  0xcc   : > { %v262_v16 = vpop.xlane.xlu1 %261 }
  0xcd   : > { %v256_v17 = vpop.xlane.xlu0 %255  ;;  %v266_v21 = vmul.f32 0.00390625, %v262_v16 }
  0xce   : > { %v264_v19 = vmul.f32 0.00390625, %v256_v17 }
  0xcf   : > { %v660_v23 = vpack.c.bf16 %v266_v21, %v265_v20 }
  0xd0   : > { %v657_v22 = vpack.c.bf16 %v264_v19, %v263_v18 }
  0xd2   : > { %658 = vmatpush3.bf16.msra.mxu0 %v657_v22 }
  0xd3   : > { %659 = vmatprep.subr.bf16.mxu0 %v835_v12 }
  0xd6   : > { %661 = vmatpush3.bf16.msra.mxu0 %v660_v23 }
  0xd9   : > { %646 = vmatmul.mubr.msk.f32.vlgmr.msra.gmra.mrb[0].mxu0 %vm269_vm1, %v267_v24 }
 0x1ac   : > { %v339_v27 = vpop.f32.mrb[0].mxu0 }
 0x1ad   : > { %v340_v28 = vadd.f32 %v339_v27, %v268_v26  ;;  %v647_v29 = vpop.f32.mrb[1].mxu0 }
 0x1af   : > { %v343_v30 = vmax.f32 %v340_v28, 0.0 }
 0x1b1   : > { %648 = vmatprep.subr.msk.mxu1 %vm365_vm3, %v343_v30 }
 0x1b2   : > { %649 = vmatpush3.msk.msra.mxu1 %vm365_vm3, %v343_v30 }
 0x1b3   : > { %651 = vmatmul.mubr.msk.f32.vlgmr.msra.gmra.mrb[0].mxu1 %vm352_vm2, %v345_v31 }
 0x1b4   : > { %653 = vmatprep.mubr.msk.f32.mxu1 %vm352_vm2, %v346_v32 }
 0x1b7   : > { %654 = vmatmul.mubr.msk.f32.gmra.mrb[2].mxu1 %vm352_vm2, %v347_v33 }
 0x286   : > { %v652_v37 = vpop.f32.mrb[0].mxu1 }
 0x287   : > { %v441_v38 = vadd.f32 %v652_v37, %v349_v35  ;;  %v435_v39 = vpop.f32.mrb[1].mxu1 }
 0x288   : > { %v436_v40 = vadd.f32 %v435_v39, %v348_v36 }
 0x289   : > { %v617_v42 = vmul.f32 -1.442695, %v441_v38 }
 0x28a   : > { %v616_v44 = vmul.f32 -1.442695, %v436_v40  ;;  %v655_v45 = vpop.f32.mrb[2].mxu1 }
 0x28b   : > { %718 = vpow2.f32 %v617_v42  ;;  %v451_v46 = vadd.f32 %v655_v45, %v351_v41  ;;  %v445_v47 = vpop.f32.mrb[3].mxu1 }
 0x28c   : > { %720 = vpow2.f32 %v616_v44  ;;  %v446_v48 = vadd.f32 %v445_v47, %v350_v43 }
 0x28d   : > { %v619_v49 = vmul.f32 -1.442695, %v451_v46 }
 0x28e   : > { %v618_v50 = vmul.f32 -1.442695, %v446_v48 }
 0x28f   : > { %722 = vpow2.f32 %v619_v49 }
 0x290   : > { %724 = vpow2.f32 %v618_v50 }
 0x295   : > { %v719_v51 = vpop.eup %718 }
 0x296   : > { %v721_v52 = vpop.eup %720  ;;  %v467_v53 = vadd.f32 1.0, %v719_v51 }
 0x297   : > { %v466_v54 = vadd.f32 1.0, %v721_v52 }
 0x298   : > { %726 = vrcp.f32 %v467_v53 }
 0x299   : > { %v723_v55 = vpop.eup %722  ;;  %728 = vrcp.f32 %v466_v54 }
 0x29a   : > { %v725_v56 = vpop.eup %724  ;;  %v469_v58 = vadd.f32 1.0, %v723_v55 }
 0x29b   : > { %v468_v57 = vadd.f32 1.0, %v725_v56 }
 0x29d   : > { %730 = vrcp.f32 %v468_v57 }
 0x29e   : > { %732 = vrcp.f32 %v469_v58 }
 0x2a2   : > { %v727_v59 = vpop.eup %726 }
 0x2a3   : > { %v729_v60 = vpop.eup %728  ;;  %485 = vperm.xlu1 %717, %v727_v59  }
 0x2a4   : > { %480 = vperm.xlu0 %716, %v729_v60  }
 0x2a7   : > { %v731_v61 = vpop.eup %730 }
 0x2a8   : > { %490 = vperm.xlu1 %717, %v731_v61   ;;  %v733_v62 = vpop.eup %732 }
 0x2ac   : > { %495 = vperm.xlu1 %717, %v733_v62  }
 0x322   : > { %v486_v63 = vpop.permute.xlu1 %485 }
 0x323   : > { %v500_v3 = vmul.f32 %v486_v63, %v1002_v8  ;;  %v501_v7 = vmul.f32 %v486_v63, %v1004_v9  ;;  %v481_v10 = vpop.permute.xlu0 %480 }
 0x324   : > { %v498_v11 = vmul.f32 %v481_v10, %v990_v2  ;;  %v499_v12 = vmul.f32 %v481_v10, %v994_v4 }
 0x325   : > { %508 = vst [vmem:[%s242_s7 + $0x10] sm:$0xff] %v500_v3  ;;  %509 = vst [vmem:[%s242_s7 + $0x18] sm:$0xff] %v501_v7 }
 0x326   : > { %506 = vst [vmem:[%s242_s7] sm:$0xff] %v498_v11  ;;  %507 = vst [vmem:[%s242_s7 + $0x8] sm:$0xff] %v499_v12 }
 0x327   : > { %v491_v13 = vpop.permute.xlu1 %490 }
 0x328   : > { %v502_v14 = vmul.f32 %v491_v13, %v986_v0  ;;  %v503_v8 = vmul.f32 %v491_v13, %v988_v1 }
 0x32a   : > { %510 = vst [vmem:[%s242_s7 + $0x20] sm:$0xff] %v502_v14  ;;  %511 = vst [vmem:[%s242_s7 + $0x28] sm:$0xff] %v503_v8 }
 0x32b   : > { %v496_v2 = vpop.permute.xlu1 %495 }
 0x32c   : > { %v504_v4 = vmul.f32 %v496_v2, %v996_v5  ;;  %v505_v0 = vmul.f32 %v496_v2, %v998_v6 }
 0x32e   : > { %512 = vst [vmem:[%s242_s7 + $0x30] sm:$0xff] %v504_v4  ;;  %513 = vst [vmem:[%s242_s7 + $0x38] sm:$0xff] %v505_v0 }
 0x32f   : > { %777 = shalt.err (!%p774_p2)
}
 0x330   : > { %s778_s12 = scalar_lea.hbm %s1054_s13, 1024  ;;  %s782_s16 = scalar_lea.hbm %s1105_s5, 2048 }
 0x331   : > { %p779_p4 = scmp.ne.s32.totalorder %s1054_s13, %s778_s12  ;;  %p783_p9 = scmp.lt.u32.totalorder %s1054_s13, %s1105_s5 }
 0x332   : > { %p784_p1 = scmp.lt.u32.totalorder %s782_s16, %s778_s12  ;;  %p786_p6 = scmp.lt.u32.totalorder %s778_s12, %s1054_s13 }
 0x333   : > { %p780_p5 = pnand %p779_p4, %p1112_p11 }
 0x334   : > { %p785_p3 = por %p784_p1, %p783_p9 }
 0x335   : > { %p781_p7 = pneg %p780_p5 }
 0x336   : > { %p787_p12 = por %p786_p6, %p785_p3 }
 0x338   : > { %p788_p13 = pnand %p787_p12, %p781_p7 }
 0x33a   : > { %791 = shalt.err (!%p788_p13)
}
 0x33b   : > { %s840_s10 = smov 256   ;;  %s841_s25 = smov 16  }
 0x33c   : > { %664 = dma.vmem_to_hbm [thread:$0]  (%p1112_p11), %s1049_s9, 1024, %s1054_s13, %s515_s22, %s840_s10, %s840_s10, %s841_s25  }
 0x33d PF: > { %s543_s11 = sand.u32 1, %s818_s18   ;;  %p1113_p8 = scmp.ne.s32.totalorder %s1110_s6, 0 }
 0x33e   : > { %p1114_p10 = scmp.ge.s32.totalorder %s830_s21, 2  ;;  %s544_s17 = scalar_lea.sflag [#allocation4], %s543_s11 }
 0x340   : > { %p671_p0 = pnand %p1114_p10, %p1113_p8 }
 0x342   : > { %813 = dma.done.wait (!%p671_p0), %s544_s17, 1024  }
 0x343   : > { %815 = vsyncadd (!%p671_p0), %s544_s17, 4294966272  ;;  %p18_p2 = scmp.ge.s32.totalorder %s897_s24, 4   ;;  %s1115_s18 = smov %s822_s19 }
 0x344   : > { %s1116_s19 = smov %s826_s20  ;;  %s1117_s20 = smov %s909_s27 }
 0x345   : > { %s1118_s21 = smov %s897_s24  ;;  %20 = sbr.rel (!%p18_p2) target bundleno = 5 (0x5), region = 85 }
 0x34c   :  { %549 = vsyncpa [#allocation3], 1 }
 0x34d   :  { %551 = vsyncpa [#allocation3 + $0x1], 1 }
 0x34e   :  { %552 = vsyncpa [#allocation4], 1 }
 0x34f   :  { %554 = vsyncpa [#allocation4 + $0x1], 1 }

</bundles_post_ra>
